<compile_context>
chip_gen: v6e
topology: v6e:2x2x1
jax: 0.10.0
libtpu: 0.0.40
codegen_flags: <defaults>
</compile_context>

<pallas_src>
import jax
import jax.numpy as jnp
from jax import lax
from jax.experimental import pallas as pl
from jax.experimental.pallas import tpu as pltpu


def _linear_kernel(x_ref, w_ref, b_ref, o_ref):
    # x_ref: (tb, K), w_ref: (N, K), b_ref: (1, N), o_ref: (tb, N)
    acc = lax.dot_general(
        x_ref[...],
        w_ref[...],
        dimension_numbers=(((1,), (1,)), ((), ())),  # contract K of both (NT matmul)
        preferred_element_type=jnp.float32,
    )
    o_ref[...] = (acc + b_ref[...]).astype(o_ref.dtype)


def _choose_batch_tile(B, K, dtype_bytes=4):
    """Pick the batch tile: as big as possible (HBM-bound), VMEM-aware,
    and guaranteeing >=2 grid steps when tiling (v7x dual TensorCores)."""
    # Budget for the double-buffered activation tile; leaves room for the
    # resident weight/bias/output under the ~32 MiB scoped-VMEM default.
    x_budget = 24 * 1024 * 1024
    vmem_cap = max(8, (x_budget // (2 * K * dtype_bytes)) // 8 * 8)

    if B <= 512 and B <= vmem_cap:
        return B  # single block: one grid step, zero extra pipeline overhead

    # Tile: at least 2 steps (<= ceil(B/2)), sublane-aligned, capped by VMEM
    # and by 1024 (diminishing returns past ~512-1024 rows).
    half = -(-B // 2)          # ceil(B / 2)
    half = -(-half // 8) * 8   # round up to multiple of 8 (sublanes)
    return max(8, min(1024, vmem_cap, half))


def linear_pallas(x2d, weight, bias):
    """x2d: (B, K) f32, weight: (N, K) f32 (nn.Linear layout), bias: (N,) -> (B, N)."""
    B, K = x2d.shape
    N, Kw = weight.shape
    assert K == Kw, f"in_features mismatch: {K} vs {Kw}"
    b2d = bias.reshape(1, N)

    tb = _choose_batch_tile(B, K, x2d.dtype.itemsize)
    grid = (pl.cdiv(B, tb),)

    return pl.pallas_call(
        _linear_kernel,
        out_shape=jax.ShapeDtypeStruct((B, N), x2d.dtype),
        grid_spec=pltpu.PrefetchScalarGridSpec(
            num_scalar_prefetch=0,
            grid=grid,
            in_specs=[
                pl.BlockSpec((tb, K), lambda i: (i, 0)),  # activations: full K per block
                pl.BlockSpec((N, K), lambda i: (0, 0)),   # weight: lane-dense, resident
                pl.BlockSpec((1, N), lambda i: (0, 0)),   # bias: resident
            ],
            out_specs=pl.BlockSpec((tb, N), lambda i: (i, 0)),
        ),
        compiler_params=pltpu.CompilerParams(
            dimension_semantics=("parallel",),  # batch steps shard across TCs (v7x)
        ),
    )(x2d, weight, b2d)


class NeuralNetworkPallas:
    """JAX/Pallas port of the PyTorch NeuralNetwork module."""

    def __init__(self, feats, days, words, key, *, small_batch_fallback=0):
        self.days = days
        self.feats = feats
        self.input_dims = feats + words
        # Batches below this threshold use plain XLA (launch overhead dominates
        # a tiny GEMV); default 0 so the Pallas kernel is always exercised.
        self.small_batch_fallback = small_batch_fallback
        in_features = self.input_dims * days
        kw, kb = jax.random.split(key)
        # Deterministic init, same shapes as nn.Linear(in_features, feats):
        # weight (out, in) = (feats, in_features), bias (feats,).
        bound = 1.0 / (in_features ** 0.5)
        self.weight = jax.random.uniform(
            kw, (feats, in_features), jnp.float32, minval=-bound, maxval=bound
        )
        self.bias = jax.random.uniform(
            kb, (feats,), jnp.float32, minval=-bound, maxval=bound
        )

    def __call__(self, x):
        # Contiguous reshape -> bitcast in XLA, no extra HBM copy before the kernel.
        x2d = x.reshape(-1, self.days * self.input_dims)
        if x2d.shape[0] < self.small_batch_fallback:
            return x2d @ self.weight.T + self.bias  # XLA fast path for tiny batches
        return linear_pallas(x2d, self.weight, self.bias)


if __name__ == "__main__":
    # Small shapes consistent with the module structure (feats kept at 11 like
    # the original spec; K = days*(feats+words) = 180 deliberately NOT a
    # multiple of 128 to exercise the full-K-block path).
    feats, days, words = 11, 6, 19          # input_dims = 30, K = 180, out = 11

    key = jax.random.PRNGKey(0)
    k_x1, k_x2, k_params = jax.random.split(key, 3)
    model = NeuralNetworkPallas(feats, days, words, k_params)

    # --- Test 1: tiny batch -> single-block path (one grid step) ---
    B1 = 4
    x1 = jax.random.normal(k_x1, (B1, days, feats + words), dtype=jnp.float32)
    out1 = jax.block_until_ready(model(x1))
    ref1 = x1.reshape(-1, days * (feats + words)) @ model.weight.T + model.bias
    assert out1.shape == (B1, feats)
    assert jnp.allclose(out1, ref1, atol=1e-4, rtol=1e-4)

    # --- Test 2: larger batch -> tiled path with >=2 'parallel' grid steps and
    # a partial last tile (masked writeback). ---
    B2 = 1100
    x2 = jax.random.normal(k_x2, (B2, days, feats + words), dtype=jnp.float32)
    out2 = jax.block_until_ready(model(x2))
    ref2 = x2.reshape(-1, days * (feats + words)) @ model.weight.T + model.bias
    assert out2.shape == (B2, feats)
    assert jnp.allclose(out2, ref2, atol=1e-4, rtol=1e-4)

    print("KERNEL_OK")
</pallas_src>

<mosaic_0001>
module attributes {stable_mosaic.version = 11 : i64} {
  func.func @_linear_kernel(%arg0: i32, %arg1: memref<4x180xf32, #tpu.memory_space<vmem>>, %arg2: memref<11x180xf32, #tpu.memory_space<vmem>>, %arg3: memref<1x11xf32, #tpu.memory_space<vmem>>, %arg4: memref<4x11xf32, #tpu.memory_space<vmem>>) attributes {dimension_semantics = [#tpu.dimension_semantics<parallel>], iteration_bounds = array<i64: 1>, scalar_prefetch = 0 : i64, scratch_operands = 0 : i64, tpu.core_type = #tpu.core_type<tc>, window_params = [{transform_indices = @transform_0, window_bounds = array<i64: 4, 180>}, {pipeline_mode = #tpu.pipeline_mode<synchronous>, transform_indices = @transform_1, window_bounds = array<i64: 11, 180>}, {pipeline_mode = #tpu.pipeline_mode<synchronous>, transform_indices = @transform_2, window_bounds = array<i64: 1, 11>}, {transform_indices = @transform_3, window_bounds = array<i64: 4, 11>}]} {
    %c0 = arith.constant 0 : index
    %c0_0 = arith.constant 0 : index
    %0 = vector.load %arg1[%c0, %c0_0] : memref<4x180xf32, #tpu.memory_space<vmem>>, vector<4x180xf32>
    %c0_1 = arith.constant 0 : index
    %c0_2 = arith.constant 0 : index
    %1 = vector.load %arg2[%c0_1, %c0_2] : memref<11x180xf32, #tpu.memory_space<vmem>>, vector<11x180xf32>
    %cst = arith.constant dense<0.000000e+00> : vector<4x11xf32>
    %2 = tpu.matmul %0, %1, %cst {dimension_numbers = #tpu.dot_dimension_numbers<[1], [1], [0], [0], [0, 0, 1, 0], [], []>} : vector<4x180xf32>, vector<11x180xf32>, vector<4x11xf32> -> vector<4x11xf32>
    %c0_3 = arith.constant 0 : index
    %c0_4 = arith.constant 0 : index
    %3 = vector.load %arg3[%c0_3, %c0_4] : memref<1x11xf32, #tpu.memory_space<vmem>>, vector<1x11xf32>
    %4 = vector.broadcast %3 : vector<1x11xf32> to vector<4x11xf32>
    %5 = arith.addf %2, %4 : vector<4x11xf32>
    %c0_5 = arith.constant 0 : index
    %c0_6 = arith.constant 0 : index
    %6 = vector.load %arg4[%c0_5, %c0_6] : memref<4x11xf32, #tpu.memory_space<vmem>>, vector<4x11xf32>
    tpu.vector_store %arg4[%c0_5, %c0_6], %5 {strides = array<i32>} : memref<4x11xf32, #tpu.memory_space<vmem>>, vector<4x11xf32>,
    return
  }
  func.func @transform_0(%arg0: i32) -> (i32, i32) {
    %c0_i32 = arith.constant 0 : i32
    %c0_i32_0 = arith.constant 0 : i32
    return %arg0, %c0_i32 : i32, i32
  }
  func.func @transform_1(%arg0: i32) -> (i32, i32) {
    %c0_i32 = arith.constant 0 : i32
    %c0_i32_0 = arith.constant 0 : i32
    %c0_i32_1 = arith.constant 0 : i32
    return %c0_i32, %c0_i32_0 : i32, i32
  }
  func.func @transform_2(%arg0: i32) -> (i32, i32) {
    %c0_i32 = arith.constant 0 : i32
    %c0_i32_0 = arith.constant 0 : i32
    %c0_i32_1 = arith.constant 0 : i32
    return %c0_i32, %c0_i32_0 : i32, i32
  }
  func.func @transform_3(%arg0: i32) -> (i32, i32) {
    %c0_i32 = arith.constant 0 : i32
    %c0_i32_0 = arith.constant 0 : i32
    return %arg0, %c0_i32 : i32, i32
  }
}

</mosaic_0001>

<bundles_post_ra>
// kernel: tpu_custom_call.1
= control target key start
LH: loop header
LB: loop body
LE: loop exit
PB: predicated region body
PF: predicated region fallthrough
CT: control target
= control target key end

     0   :  { %8 = vsyncpa [#allocation3], 0  ;;  %s265_s0 = inlined_call_operand.hbm [shape: f32[4,180], index: 0, kind: input, shape index: {}]   ;;  %s266_s1 = inlined_call_operand.hbm [shape: f32[11,180], index: 1, kind: input, shape index: {}]   ;;  %s267_s2 = inlined_call_operand.vmem [shape: f32[1,11], index: 2, kind: input, shape index: {}]   ;;  %s268_s3 = inlined_call_operand.hbm [shape: f32[4,11], index: 3, kind: output, shape index: {}]  }
   0x1   :  { %9 = vsyncpa [#allocation6], 0 }
   0x2   :  { %10 = vsyncpa [#allocation4], 0  ;;  %s228_s12 = smov [#allocation2]   ;;  %s229_s14 = smov [#allocation5]  }
   0x3   :  { %s17_s13 = sshll.u32 %s228_s12, 4  ;;  %s26_s15 = sshll.u32 %s229_s14, 4  ;;  %s18_s13 = int_to_ptr.vmem [resolvable:$true] %s17_s13  ;;  %s27_s15 = int_to_ptr.vmem [resolvable:$true] %s26_s15 }
   0x4   :  { %s170_s16 = scalar_lea.vmem %s18_s13, 128  ;;  %p175_p1 = scmp.lt.s32.totalorder %s18_s13, %s18_s13 }
   0x5   :  { %p171_p0 = scmp.ne.s32.totalorder %s18_s13, %s170_s16  ;;  %p176_p2 = scmp.lt.s32.totalorder %s170_s16, %s170_s16 }
   0x7   :  { %p177_p3 = por %p176_p2, %p175_p1 }
   0x9   :  { %p178_p4 = pnand %p177_p3, %p171_p0 }
   0xb   :  { %181 = shalt.err (!%p178_p4)
}
   0xc   :  { %20 = dma.hbm_to_vmem [thread:$0]  %s265_s0, 128, %s18_s13, [#allocation3]  }
   0xd   :  { %s190_s19 = scalar_lea.vmem %s27_s15, 512  ;;  %p195_p6 = scmp.lt.s32.totalorder %s27_s15, %s27_s15 }
   0xe   :  { %p191_p5 = scmp.ne.s32.totalorder %s27_s15, %s190_s19  ;;  %p196_p7 = scmp.lt.s32.totalorder %s190_s19, %s190_s19 }
  0x10   :  { %p197_p8 = por %p196_p7, %p195_p6 }
  0x12   :  { %p198_p9 = pnand %p197_p8, %p191_p5 }
  0x14   :  { %201 = shalt.err (!%p198_p9)
}
  0x15   :  { %s230_s20 = smov 256   ;;  %s231_s21 = smov 16  }
  0x16   :  { %32 = dma.hbm_to_vmem [thread:$0]  %s266_s1, 512, %s27_s15, [#allocation6], %s230_s20, %s230_s20, %s231_s21  }
  0x17   :  { %222 = dma.done.wait [#allocation3], 128  }
  0x18   :  { %223 = vsyncadd [#allocation3], 4294967168 }
  0x19   :  { %224 = dma.done.wait [#allocation6], 512  }
  0x1a   :  { %225 = vsyncadd [#allocation6], 4294966784  ;;  %vm55_vm0 = vcmask 424960   ;;  %v45_v0 = vld [vmem:[#allocation5 + $0x18] sm:$0x7]  ;;  %v43_v2 = vld [vmem:[#allocation5 + $0x8] sm:$0xff] }
  0x1b   :  { %v44_v1 = vld [vmem:[#allocation5 + $0x10] sm:$0x7]  ;;  %153 = vmatprep.subr.msk.mxu0 %vm55_vm0, %v45_v0  ;;  %v41_v3 = vld [vmem:[#allocation2] sm:$0xff]  ;;  %v42_v5 = vld [vmem:[#allocation5] sm:$0xff]  ;;  %s232_s1 = smov [#allocation7]   ;;  %vm134_vm1 = vcmask 84992  }
  0x1c   :  { %93 = vmatpush1.xpose.msra.mxu0 %v44_v1  ;;  %v54_v4 = vcombine.high %v41_v3, %v41_v3  ;;  %v152_v6 = vld [vmem:[%s267_s2] ss:$0 sm:$0xff]  ;;  %s142_s25 = sshll.u32 %s232_s1, 4  ;;  %s143_s25 = int_to_ptr.vmem [resolvable:$true] %s142_s25 }
  0x1d   :  { %154 = vmatprep.subr.msk.mxu0 %vm55_vm0, %v43_v2  ;;  %s202_s26 = scalar_lea.vmem %s143_s25, 64  ;;  %p207_p11 = scmp.lt.s32.totalorder %s143_s25, %s143_s25 }
  0x1e   :  { %155 = vmatprep.mubr.msk.f32.mxu0 %vm55_vm0, %v54_v4  ;;  %p203_p10 = scmp.ne.s32.totalorder %s143_s25, %s202_s26  ;;  %p208_p12 = scmp.lt.s32.totalorder %s202_s26, %s202_s26 }
  0x20   :  { %95 = vmatpush1.xpose.msra.mxu0 %v42_v5  ;;  %p209_p13 = por %p208_p12, %p207_p11 }
  0x22   :  { %p210_p0 = pnand %p209_p13, %p203_p10 }
  0x23   :  { %129 = vmatmul.mubr.f32.vlgmr.msra.gmra.mxu0 %v41_v3 }
  0xe3   :  { %v130_v7 = vpop.f32.mrf.mxu0 }
  0xe4   :  { %v131_v8 = vadd.f32 %v152_v6, %v130_v7 }
  0xe5   :  { %v132_v9 = vpop.f32.mrf.mxu0 }
  0xe6   :  { %135 = vst.msk [vmem:[#allocation7] sm:$0xf] %vm134_vm1, %v131_v8 }
  0xe7   :  { %213 = shalt.err (!%p210_p0)
}
  0xe8   :  { %145 = dma.vmem_to_hbm [thread:$0]  %s143_s25, 64, %s268_s3, [#allocation4]  }
  0xe9   :  { %226 = dma.done.wait [#allocation4], 64  }
  0xea   :  { %227 = vsyncadd [#allocation4], 4294967232 }
  0xeb   :  { %149 = vsyncpa [#allocation3], 1 }
  0xec   :  { %150 = vsyncpa [#allocation6], 1 }
  0xed   :  { %151 = vsyncpa [#allocation4], 1 }

</bundles_post_ra>
